<compile_context>
chip_gen: v5e
topology: v5e:2x2
jax: 0.10.0
libtpu: 0.0.40
codegen_flags: <defaults>
</compile_context>

<pallas_src>
import functools

import jax
import jax.numpy as jnp
from jax.experimental import pallas as pl
from jax.experimental.pallas import tpu as pltpu

IN_FEATURES = 2048
OUT_FEATURES = 2
N_PAD = 128              # lane-dense padded weight width (MXU-friendly)
TB_DEFAULT = 1024        # batch tile rows (8 MiB f32 per x buffer)
MIN_PALLAS_BATCH = 256   # below this (and not forced), bypass Pallas


def _round_up(a, m):
    return ((a + m - 1) // m) * m


def _linear_kernel(x_ref, w_ref, b_ref, o_ref):
    # x_ref: (tb, 2048)   streamed batch tile (last block may be ragged)
    # w_ref: (2048, 128)  resident, pre-transposed + zero-padded weight
    # b_ref: (1, 2)       resident bias
    # o_ref: (tb, 2)      true-width output tile (2-lane masked stores; tiny
    #                     vs. the 8 MiB input DMA, so cheaper than a 128-lane
    #                     slab + wrapper slice round trip)
    acc = jnp.dot(x_ref[...], w_ref[...], preferred_element_type=jnp.float32)
    o_ref[...] = (acc[:, :OUT_FEATURES] + b_ref[...]).astype(o_ref.dtype)


@functools.partial(jax.jit, static_argnames=("tb", "force_pallas"))
def linear_2048_to_2(x, w_t_pad, bias2, *, tb=TB_DEFAULT, force_pallas=False):
    """x: (B, 2048) f32, w_t_pad: (2048, 128) f32, bias2: (1, 2) f32 -> (B, 2) f32."""
    B, K = x.shape
    assert K == IN_FEATURES
    assert w_t_pad.shape == (IN_FEATURES, N_PAD)
    assert bias2.shape == (1, OUT_FEATURES)

    # Small-batch fast path: a fused XLA dot beats kernel dispatch overhead.
    if B < MIN_PALLAS_BATCH and not force_pallas:
        return x @ w_t_pad[:, :OUT_FEATURES] + bias2

    # Only pad rows up to a multiple of 8 (sublane) when needed; never to a
    # multiple of the tile size.  For the common case (B % 8 == 0) this is a
    # no-op and x is streamed straight from HBM with no extra copy.
    B8 = _round_up(B, 8)
    xp = x if B8 == B else jnp.pad(x, ((0, B8 - B), (0, 0)))

    tb_eff = min(tb, B8)            # clamp so the block never exceeds the array
    grid_b = pl.cdiv(B8, tb_eff)    # ragged last block handled by Pallas

    # NOTE(correctness): the ragged last x block exposes undefined rows to the
    # MXU; this is safe only because there is no cross-row reduction and the
    # out-of-bounds output rows are dropped by the masked store.
    out = pl.pallas_call(
        _linear_kernel,
        out_shape=jax.ShapeDtypeStruct((B8, OUT_FEATURES), jnp.float32),
        grid=(grid_b,),
        in_specs=[
            pl.BlockSpec((tb_eff, K), lambda i: (i, 0)),          # x: streamed
            pl.BlockSpec((K, N_PAD), lambda i: (0, 0)),           # weight: resident
            pl.BlockSpec((1, OUT_FEATURES), lambda i: (0, 0)),    # bias: resident
        ],
        out_specs=pl.BlockSpec((tb_eff, OUT_FEATURES), lambda i: (i, 0)),
        compiler_params=pltpu.CompilerParams(
            # On v7x, pltpu.CORE_PARALLEL on this axis shards the batch grid
            # across both TensorCores; "parallel" kept for v5e/v6e portability.
            dimension_semantics=("parallel",),
            vmem_limit_bytes=40 << 20,  # ~18 MiB used at tb=1024; < 64 MiB v7x VMEM
        ),
        cost_estimate=pl.CostEstimate(
            flops=2 * B8 * K * N_PAD,   # MXU does the padded-N work
            transcendentals=0,
            bytes_accessed=B8 * K * 4 + K * N_PAD * 4 + B8 * OUT_FEATURES * 4,
        ),
    )(xp, w_t_pad, bias2)

    return out[:B] if B8 != B else out


class FullyConnected:
    """JAX/Pallas mirror of the PyTorch `fully_connected` module."""

    def __init__(self, key):
        kw, kb = jax.random.split(key)
        # Deterministic init mimicking nn.Linear default (uniform +/- 1/sqrt(fan_in)).
        bound = 1.0 / jnp.sqrt(IN_FEATURES)
        self.weight = jax.random.uniform(
            kw, (OUT_FEATURES, IN_FEATURES), jnp.float32, -bound, bound
        )
        self.bias = jax.random.uniform(
            kb, (OUT_FEATURES,), jnp.float32, -bound, bound
        )
        # One-time (hoisted) kernel-layout params: weight transposed and
        # zero-padded to the 128-lane MXU width; bias as (1, 2).
        self.w_t_pad = (
            jnp.zeros((IN_FEATURES, N_PAD), jnp.float32)
            .at[:, :OUT_FEATURES]
            .set(self.weight.T)
        )
        self.bias2 = self.bias.reshape(1, OUT_FEATURES)

    def __call__(self, x, output_features=False, train_robust=False,
                 *, tb=TB_DEFAULT, force_pallas=False):
        if output_features:
            return x
        y = linear_2048_to_2(x, self.w_t_pad, self.bias2,
                             tb=tb, force_pallas=force_pallas)
        if train_robust:
            return [y, x]
        return y


if __name__ == "__main__":
    key = jax.random.PRNGKey(0)
    k_params, k_x1, k_x2 = jax.random.split(key, 3)

    model = FullyConnected(k_params)

    def ref_fn(x):
        return (
            jnp.dot(x, model.weight.T, precision=jax.lax.Precision.HIGHEST)
            + model.bias
        )

    # --- Multi-tile + ragged-last-block kernel path (small tile override). ---
    B1 = 40
    x1 = jax.random.normal(k_x1, (B1, IN_FEATURES), jnp.float32)
    out1 = jax.block_until_ready(model(x1, tb=16, force_pallas=True))
    assert out1.shape == (B1, OUT_FEATURES) and out1.dtype == jnp.float32
    assert jnp.allclose(out1, ref_fn(x1), atol=1e-3, rtol=1e-3)

    # --- Default tile (clamped to the batch), single-block kernel path. ---
    out1b = jax.block_until_ready(model(x1, force_pallas=True))
    assert jnp.allclose(out1b, ref_fn(x1), atol=1e-3, rtol=1e-3)

    # --- Tiny non-multiple-of-8 batch: exercises the row-pad-to-8 path. ---
    B2 = 4
    x2 = jax.random.normal(k_x2, (B2, IN_FEATURES), jnp.float32)
    out2 = jax.block_until_ready(model(x2, tb=16, force_pallas=True))
    assert out2.shape == (B2, OUT_FEATURES)
    assert jnp.allclose(out2, ref_fn(x2), atol=1e-3, rtol=1e-3)

    # --- Small-batch XLA fast path + flag-controlled module paths (glue). ---
    out_fast = jax.block_until_ready(model(x2))
    assert jnp.allclose(out_fast, ref_fn(x2), atol=1e-3, rtol=1e-3)

    feats = model(x2, output_features=True)
    robust_out, robust_feats = model(x2, train_robust=True, force_pallas=True)
    jax.block_until_ready(robust_out)
    assert feats.shape == (B2, IN_FEATURES)
    assert robust_out.shape == (B2, OUT_FEATURES)
    assert robust_feats.shape == (B2, IN_FEATURES)
    assert jnp.allclose(robust_out, ref_fn(x2), atol=1e-3, rtol=1e-3)

    print("KERNEL_OK")
</pallas_src>

<mosaic_0001>
module attributes {stable_mosaic.version = 11 : i64} {
  func.func @_linear_kernel(%arg0: i32, %arg1: memref<16x2048xf32, #tpu.memory_space<vmem>>, %arg2: memref<2048x128xf32, #tpu.memory_space<vmem>>, %arg3: memref<1x2xf32, #tpu.memory_space<vmem>>, %arg4: memref<16x2xf32, #tpu.memory_space<vmem>>) attributes {dimension_semantics = [#tpu.dimension_semantics<parallel>], iteration_bounds = array<i64: 3>, scalar_prefetch = 0 : i64, scratch_operands = 0 : i64, tpu.core_type = #tpu.core_type<tc>, window_params = [{transform_indices = @transform_0, window_bounds = array<i64: 16, 2048>}, {pipeline_mode = #tpu.pipeline_mode<synchronous>, transform_indices = @transform_1, window_bounds = array<i64: 2048, 128>}, {pipeline_mode = #tpu.pipeline_mode<synchronous>, transform_indices = @transform_2, window_bounds = array<i64: 1, 2>}, {transform_indices = @transform_3, window_bounds = array<i64: 16, 2>}]} {
    %c0 = arith.constant 0 : index
    %c0_0 = arith.constant 0 : index
    %0 = vector.load %arg1[%c0, %c0_0] : memref<16x2048xf32, #tpu.memory_space<vmem>>, vector<16x2048xf32>
    %c0_1 = arith.constant 0 : index
    %c0_2 = arith.constant 0 : index
    %1 = vector.load %arg2[%c0_1, %c0_2] : memref<2048x128xf32, #tpu.memory_space<vmem>>, vector<2048x128xf32>
    %cst = arith.constant dense<0.000000e+00> : vector<16x128xf32>
    %2 = tpu.matmul %0, %1, %cst {dimension_numbers = #tpu.dot_dimension_numbers<[1], [0], [0], [1], [0, 0, 1, 1], [], []>} : vector<16x2048xf32>, vector<2048x128xf32>, vector<16x128xf32> -> vector<16x128xf32>
    %3 = vector.extract_strided_slice %2 {offsets = [0, 0], sizes = [16, 2], strides = [1, 1]} : vector<16x128xf32> to vector<16x2xf32>
    %c0_3 = arith.constant 0 : index
    %c0_4 = arith.constant 0 : index
    %4 = vector.load %arg3[%c0_3, %c0_4] : memref<1x2xf32, #tpu.memory_space<vmem>>, vector<1x2xf32>
    %5 = vector.broadcast %4 : vector<1x2xf32> to vector<16x2xf32>
    %6 = arith.addf %3, %5 : vector<16x2xf32>
    %c0_5 = arith.constant 0 : index
    %c0_6 = arith.constant 0 : index
    %7 = vector.load %arg4[%c0_5, %c0_6] : memref<16x2xf32, #tpu.memory_space<vmem>>, vector<16x2xf32>
    tpu.vector_store %arg4[%c0_5, %c0_6], %6 {strides = array<i32>} : memref<16x2xf32, #tpu.memory_space<vmem>>, vector<16x2xf32>,
    return
  }
  func.func @transform_0(%arg0: i32) -> (i32, i32) {
    %c0_i32 = arith.constant 0 : i32
    %c0_i32_0 = arith.constant 0 : i32
    return %arg0, %c0_i32 : i32, i32
  }
  func.func @transform_1(%arg0: i32) -> (i32, i32) {
    %c0_i32 = arith.constant 0 : i32
    %c0_i32_0 = arith.constant 0 : i32
    %c0_i32_1 = arith.constant 0 : i32
    return %c0_i32, %c0_i32_0 : i32, i32
  }
  func.func @transform_2(%arg0: i32) -> (i32, i32) {
    %c0_i32 = arith.constant 0 : i32
    %c0_i32_0 = arith.constant 0 : i32
    %c0_i32_1 = arith.constant 0 : i32
    return %c0_i32, %c0_i32_0 : i32, i32
  }
  func.func @transform_3(%arg0: i32) -> (i32, i32) {
    %c0_i32 = arith.constant 0 : i32
    %c0_i32_0 = arith.constant 0 : i32
    return %arg0, %c0_i32 : i32, i32
  }
}

</mosaic_0001>

<bundles_post_ra>
// kernel: linear_2048_to_2.1
= control target key start
LH: loop header
LB: loop body
LE: loop exit
PB: predicated region body
PF: predicated region fallthrough
CT: control target
= control target key end

     0   :  { %8 = vsyncpa [#allocation3], 0  ;;  %s1694_s0 = inlined_call_operand.hbm [shape: f32[40,2048], index: 0, kind: input, shape index: {}]   ;;  %s1695_s1 = inlined_call_operand.hbm [shape: f32[2048,128], index: 1, kind: input, shape index: {}]   ;;  %s1696_s2 = inlined_call_operand.vmem [shape: f32[1,2], index: 2, kind: input, shape index: {}]   ;;  %s1697_s3 = inlined_call_operand.vmem [shape: f32[40,2], index: 3, kind: output, shape index: {}]  }
   0x1   :  { %10 = vsyncpa [#allocation3 + $0x1], 0 }
   0x2   :  { %11 = vsyncpa [#allocation5], 0  ;;  %s1482_s12 = smov 0   ;;  %s1484_s13 = smov 0  }
   0x3   :  { %s1486_s14 = smov 0   ;;  %s1488_s15 = smov 0  }
   0x4 LB: > { %s1501_s16 = sadd.s32 4294967295, %s1422_s15   ;;  %s1504_s17 = sadd.s32 1, %s1422_s15   ;;  %s1422_s15 = sphi %s1488_s15, %s1709_s15   ;;  %s1418_s14 = sphi %s1486_s14, %s1708_s14   ;;  %s1414_s13 = sphi %s1484_s13, %s1707_s13   ;;  %s1410_s12 = sphi %s1482_s12, %s1706_s12  }
   0x5   : > { %s21_s18 = ssub.s32 %s1422_s15, %s1504_s17  ;;  %s24_s19 = sadd.s32 1, %s1418_s14 }
   0x6   : > { %p22_p0 = scmp.eq.s32.totalorder %s21_s18, 0  ;;  %p31_p1 = scmp.ne.s32.totalorder %s1418_s14, %s1414_s13 }
   0x7   : > { %p32_p2 = scmp.eq.s32.totalorder %s1422_s15, 0  ;;  %p37_p3 = scmp.ne.s32.totalorder %s1414_s13, %s1410_s12 }
   0x8   : > { %s1514_s20 = scalar_select %p22_p0, %s1418_s14, %s24_s19  }
   0x9   : > { %p1516_p4 = por %p32_p2, %p31_p1  ;;  %p1698_p5 = scmp.eq.s32.totalorder %s1501_s16, 0 }
   0xa   : > { %p103_p6 = scmp.eq.s32.totalorder %s1501_s16, 2  ;;  %p1131_p7 = scmp.ge.s32.totalorder %s1422_s15, 1 }
   0xb   : > { %p1525_p8 = por %p1698_p5, %p37_p3  ;;  %p116_p9 = scmp.lt.s32.totalorder %s1422_s15, 4 }
   0xc   : > { %p1530_p10 = por %p103_p6, %p31_p1  ;;  %s127_s27 = sshll.u32 %s1695_s1, 4  ;;  %s128_s27 = int_to_ptr.hbm [resolvable:$true] %s127_s27 }
   0xd   : > { %p1534_p11 = pnand %p1131_p7, %p116_p9  ;;  %s1456_s28 = smov [#allocation4]  }
   0xe   : > { %s129_s29 = sshll.u32 %s1456_s28, 4  ;;  %s1457_s30 = smov 128   ;;  %s130_s29 = int_to_ptr.vmem [resolvable:$true] %s129_s29 }
   0xf   : > { %p1175_p12 = pneg %p1534_p11  ;;  %s1458_s4 = smov 8  }
  0x10   : > { %p1133_p0 = scmp.ge.s32.totalorder %s1422_s15, 3 }
  0x11   : > { %p1176_p13 = pnand %p1175_p12, %p1698_p5 }
  0x12   : > { %142 = sbr.rel (%p1133_p0) target bundleno = 59 (0x3b), region = 24 }
  0x13   : > { %1178 = dma.hbm_to_vmem [thread:$0]  (!%p1176_p13), %s128_s27, 32768, %s130_s29, [#allocation5], %s1457_s30, %s1457_s30, %s1458_s4  }
  0x17   : > { %145 = sbr.rel (!%p1516_p4) target bundleno = 59 (0x3b), region = 28  ;;  %s146_s5 = sand.u32 (%p1516_p4), 1, %s1418_s14  }
  0x18   : > { %s1135_s6 = sshll.u32 (%p1516_p4), %s1422_s15, 1  ;;  %s1134_s7 = sshll.u32 (%p1516_p4), %s146_s5, 8 }
  0x19   : > { %s152_s8 = ssub.s32 (%p1516_p4), 5, %s1135_s6  ;;  %s1553_s12 = scalar_lea.sflag (%p1516_p4), [#allocation3], %s146_s5 }
  0x1a   : > { %p153_p1 = scmp.lt.s32.totalorder (%p1516_p4), %s152_s8, 2  ;;  %s150_s18 = scalar_lea.vmem (%p1516_p4), [#allocation2], %s1134_s7 }
  0x1c   : > { %s1711_s8 = smov (!%p153_p1, %s152_s8), 2 }
  0x1d   : > { %s1164_s9 = sshll.u32 %s1711_s8, 7 }
  0x1e   : > { %s157_s10 = ssub.s32 256, %s1164_s9 }
  0x1f   : > { %s158_s11 = sshll.u32 %s157_s10, 4 }
  0x20   : > { %159 = vsyncadd %s1553_s12, %s158_s11  ;;  %p1556_p2 = scmp.ne.s32.totalorder %s1164_s9, 0  ;;  %s1166_s21 = sshll.u32 %s1422_s15, 8 }
  0x21   : > { %s163_s27 = scalar_lea.hbm %s1694_s0, %s1166_s21  ;;  %s1564_s28 = sshll.u32 %s150_s18, 4  ;;  %s168_s28 = int_to_ptr.vmem [resolvable:$true] %s1564_s28 }
  0x22   : > { %s165_s29 = sshll.u32 %s163_s27, 4  ;;  %s1142_s30 = sshll.u32 %s1711_s8, 11  ;;  %s1567_s29 = int_to_ptr.hbm [resolvable:$true] %s165_s29 }
  0x23   : > { %s1313_s4 = sshra.s32 %s1567_s29, 4  ;;  %s1315_s5 = sshrl.u32 %s1142_s30, 4  ;;  %s1314_s4 = int_to_ptr.hbm [resolvable:$true] %s1313_s4 }
  0x24   : > { %s1320_s6 = scalar_lea.hbm %s1314_s4, %s1315_s5  ;;  %s1324_s9 = scalar_lea.hbm %s1694_s0, 640 }
  0x25   : > { %p1321_p3 = scmp.ne.s32.totalorder %s1314_s4, %s1320_s6  ;;  %p1325_p7 = scmp.lt.s32.totalorder %s1314_s4, %s1694_s0 }
  0x26   : > { %p1326_p9 = scmp.lt.s32.totalorder %s1324_s9, %s1320_s6 }
  0x27   : > { %p1322_p4 = pnand %p1321_p3, %p1556_p2 }
  0x28   : > { %p1327_p12 = por %p1326_p9, %p1325_p7 }
  0x29   : > { %p1323_p6 = pneg %p1322_p4 }
  0x2b   : > { %p1328_p13 = pnand %p1327_p12, %p1323_p6 }
  0x2d   : > { %1331 = shalt.err (!%p1328_p13)
}
  0x2e   : > { %s1332_s18 = sshra.s32 %s168_s28, 4  ;;  %s1459_s25 = smov [#allocation2]   ;;  %s1333_s18 = int_to_ptr.vmem [resolvable:$true] %s1332_s18 }
  0x2f   : > { %s1339_s21 = scalar_lea.vmem %s1333_s18, %s1315_s5  ;;  %s1343_s26 = scalar_lea.vmem %s1459_s25, 512 }
  0x30   : > { %p1340_p0 = scmp.ne.s32.totalorder %s1333_s18, %s1339_s21  ;;  %p1345_p4 = scmp.lt.s32.totalorder %s1343_s26, %s1339_s21 }
  0x32   : > { %p1341_p1 = pnand %p1340_p0, %p1556_p2 }
  0x34   : > { %p1342_p3 = pneg %p1341_p1 }
  0x36   : > { %p1347_p5 = pnand %p1345_p4, %p1342_p3 }
  0x38   : > { %1350 = shalt.err (!%p1347_p5)
}
  0x39   : > { %s1460_s27 = smov 2048   ;;  %s1461_s4 = smov 128  }
  0x3a   : > { %173 = dma.hbm_to_vmem [thread:$0]  (%p1556_p2), %s1567_s29, %s1142_s30, %s168_s28, %s1553_s12, %s1460_s27, %s1460_s27, %s1461_s4  }
  0x3b PF: > { %179 = sbr.rel (%p1534_p11) target bundleno = 395 (0x18b), region = 32  ;;  %s1596_s5 = sand.u32 (!%p1534_p11), 1, %s1414_s13  }
  0x3c   : > { %s1144_s6 = sshll.u32 (!%p1534_p11), %s1596_s5, 8  ;;  %s182_s15 = scalar_lea.sflag (!%p1534_p11), [#allocation3], %s1596_s5 }
  0x3d   : > { %s1600_s7 = scalar_lea.vmem (!%p1534_p11), [#allocation2], %s1144_s6 }
  0x40   : > { %1401 = dma.done.wait (%p1525_p8), %s182_s15, 4096  }
  0x41   : > { %1403 = vsyncadd (%p1525_p8), %s182_s15, 4294963200  ;;  %p1704_p5 = scmp.eq.s32.totalorder %s1501_s16, 0 }
  0x43   : > { %1405 = dma.done.wait (%p1704_p5), [#allocation5], 32768   ;;  %p1705_p11 = pmov %p1704_p5 }
  0x44   : > { %v271_v0 = vld [vmem:[#allocation4 + $0x78] sm:$0xff]  ;;  %v270_v2 = vld [vmem:[#allocation4 + $0x70] sm:$0xff]  ;;  %v269_v6 = vld [vmem:[#allocation4 + $0x68] sm:$0xff]  ;;  %s1146_s22 = sshll.u32 %s1596_s5, 4  ;;  %vm886_vm0 = vcmask 15360   ;;  %s1148_s19 = sshll.u32 (%p1530_p10), %s1501_s16, 1 }
  0x45   : > { %1407 = vsyncadd (%p1705_p11), [#allocation5], 4294934528  ;;  %v303_v1 = vld [vmem:[#allocation4 + $0x178] sm:$0xff]  ;;  %512 = vmatpush.msra.mxu0 %v271_v0  ;;  %v302_v4 = vld [vmem:[#allocation4 + $0x170] sm:$0xff]  ;;  %s1646_s12 = scalar_lea.vmem [#allocation6], %s1146_s22   ;;  %s1167_s28 = sshll.u32 (%p1530_p10), %s1501_s16, 4 }
  0x46   : > { %558 = vmatpush.msra.mxu2 %v303_v1  ;;  %v287_v3 = vld [vmem:[#allocation4 + $0xf8] sm:$0xff]  ;;  %v286_v7 = vld [vmem:[#allocation4 + $0xf0] sm:$0xff]  ;;  %v301_v8 = vld [vmem:[#allocation4 + $0x168] sm:$0xff]  ;;  %s897_s29 = ssub.s32 (%p1530_p10), 5, %s1148_s19  ;;  %s1657_s10 = scalar_lea.vmem (%p1530_p10), %s1697_s3, %s1167_s28  }
  0x47   : > { %v319_v5 = vld [vmem:[#allocation4 + $0x1f8] sm:$0xff]  ;;  %535 = vmatpush.msra.mxu1 %v287_v3  ;;  %513 = vmatpush.msra.mxu0 %v270_v2  ;;  %v318_v9 = vld [vmem:[#allocation4 + $0x1f0] sm:$0xff]  ;;  %v285_v10 = vld [vmem:[#allocation4 + $0xe8] sm:$0xff]  ;;  %p898_p8 = scmp.lt.s32.totalorder (%p1530_p10), %s897_s29, 2 }
  0x48   : > { %581 = vmatpush.msra.mxu3 %v319_v5  ;;  %559 = vmatpush.msra.mxu2 %v302_v4  ;;  %v268_v11 = vld [vmem:[#allocation4 + $0x60] sm:$0xff]  ;;  %v317_v13 = vld [vmem:[#allocation4 + $0x1e8] sm:$0xff]  ;;  %v267_v16 = vld [vmem:[#allocation4 + $0x58] sm:$0xff] }
  0x49   : > { %536 = vmatpush.msra.mxu1 %v286_v7  ;;  %v300_v12 = vld [vmem:[#allocation4 + $0x160] sm:$0xff]  ;;  %514 = vmatpush.msra.mxu0 %v269_v6  ;;  %v299_v17 = vld [vmem:[#allocation4 + $0x158] sm:$0xff]  ;;  %v266_v20 = vld [vmem:[#allocation4 + $0x50] sm:$0xff] }
  0x4a   : > { %582 = vmatpush.msra.mxu3 %v318_v9  ;;  %560 = vmatpush.msra.mxu2 %v301_v8  ;;  %v284_v14 = vld [vmem:[#allocation4 + $0xe0] sm:$0xff]  ;;  %v283_v18 = vld [vmem:[#allocation4 + $0xd8] sm:$0xff]  ;;  %v298_v21 = vld [vmem:[#allocation4 + $0x150] sm:$0xff] }
  0x4b   : > { %v316_v15 = vld [vmem:[#allocation4 + $0x1e0] sm:$0xff]  ;;  %537 = vmatpush.msra.mxu1 %v285_v10  ;;  %515 = vmatpush.msra.mxu0 %v268_v11  ;;  %v315_v19 = vld [vmem:[#allocation4 + $0x1d8] sm:$0xff]  ;;  %v282_v22 = vld [vmem:[#allocation4 + $0xd0] sm:$0xff] }
  0x4c   : > { %583 = vmatpush.msra.mxu3 %v317_v13  ;;  %561 = vmatpush.msra.mxu2 %v300_v12  ;;  %v314_v23 = vld [vmem:[#allocation4 + $0x1d0] sm:$0xff]  ;;  %v265_v24 = vld [vmem:[#allocation4 + $0x48] sm:$0xff]  ;;  %v264_v28 = vld [vmem:[#allocation4 + $0x40] sm:$0xff] }
  0x4d   : > { %538 = vmatpush.msra.mxu1 %v284_v14  ;;  %516 = vmatpush.msra.mxu0 %v267_v16  ;;  %v297_v25 = vld [vmem:[#allocation4 + $0x148] sm:$0xff]  ;;  %v296_v29 = vld [vmem:[#allocation4 + $0x140] sm:$0xff]  ;;  %v263_v32 = vld [vmem:[#allocation4 + $0x38] sm:$0xff] }
  0x4e   : > { %584 = vmatpush.msra.mxu3 %v316_v15  ;;  %562 = vmatpush.msra.mxu2 %v299_v17  ;;  %v281_v26 = vld [vmem:[#allocation4 + $0xc8] sm:$0xff]  ;;  %v280_v30 = vld [vmem:[#allocation4 + $0xc0] sm:$0xff]  ;;  %v295_v33 = vld [vmem:[#allocation4 + $0x138] sm:$0xff] }
  0x4f   : > { %539 = vmatpush.msra.mxu1 %v283_v18  ;;  %517 = vmatpush.msra.mxu0 %v266_v20  ;;  %v313_v27 = vld [vmem:[#allocation4 + $0x1c8] sm:$0xff]  ;;  %v312_v31 = vld [vmem:[#allocation4 + $0x1c0] sm:$0xff]  ;;  %v279_v34 = vld [vmem:[#allocation4 + $0xb8] sm:$0xff] }
  0x50   : > { %585 = vmatpush.msra.mxu3 %v315_v19  ;;  %563 = vmatpush.msra.mxu2 %v298_v21  ;;  %v311_v35 = vld [vmem:[#allocation4 + $0x1b8] sm:$0xff]  ;;  %v262_v36 = vld [vmem:[#allocation4 + $0x30] sm:$0xff]  ;;  %v261_v40 = vld [vmem:[#allocation4 + $0x28] sm:$0xff] }
  0x51   : > { %540 = vmatpush.msra.mxu1 %v282_v22  ;;  %518 = vmatpush.msra.mxu0 %v265_v24  ;;  %v294_v37 = vld [vmem:[#allocation4 + $0x130] sm:$0xff]  ;;  %v293_v41 = vld [vmem:[#allocation4 + $0x128] sm:$0xff]  ;;  %v260_v44 = vld [vmem:[#allocation4 + $0x20] sm:$0xff] }
  0x52   : > { %586 = vmatpush.msra.mxu3 %v314_v23  ;;  %564 = vmatpush.msra.mxu2 %v297_v25  ;;  %v278_v38 = vld [vmem:[#allocation4 + $0xb0] sm:$0xff]  ;;  %v277_v42 = vld [vmem:[#allocation4 + $0xa8] sm:$0xff]  ;;  %v292_v45 = vld [vmem:[#allocation4 + $0x120] sm:$0xff] }
  0x53   : > { %541 = vmatpush.msra.mxu1 %v281_v26  ;;  %519 = vmatpush.msra.mxu0 %v264_v28  ;;  %v310_v39 = vld [vmem:[#allocation4 + $0x1b0] sm:$0xff]  ;;  %v309_v43 = vld [vmem:[#allocation4 + $0x1a8] sm:$0xff]  ;;  %v276_v46 = vld [vmem:[#allocation4 + $0xa0] sm:$0xff] }
  0x54   : > { %587 = vmatpush.msra.mxu3 %v313_v27  ;;  %565 = vmatpush.msra.mxu2 %v296_v29  ;;  %v308_v47 = vld [vmem:[#allocation4 + $0x1a0] sm:$0xff]  ;;  %v259_v48 = vld [vmem:[#allocation4 + $0x18] sm:$0xff]  ;;  %v258_v52 = vld [vmem:[#allocation4 + $0x10] sm:$0xff] }
  0x55   : > { %542 = vmatpush.msra.mxu1 %v280_v30  ;;  %520 = vmatpush.msra.mxu0 %v263_v32  ;;  %v291_v49 = vld [vmem:[#allocation4 + $0x118] sm:$0xff]  ;;  %v290_v53 = vld [vmem:[#allocation4 + $0x110] sm:$0xff]  ;;  %v257_v56 = vld [vmem:[#allocation4 + $0x8] sm:$0xff] }
  0x56   : > { %588 = vmatpush.msra.mxu3 %v312_v31  ;;  %566 = vmatpush.msra.mxu2 %v295_v33  ;;  %v275_v50 = vld [vmem:[#allocation4 + $0x98] sm:$0xff]  ;;  %v274_v54 = vld [vmem:[#allocation4 + $0x90] sm:$0xff]  ;;  %v289_v57 = vld [vmem:[#allocation4 + $0x108] sm:$0xff] }
  0x57   : > { %543 = vmatpush.msra.mxu1 %v279_v34  ;;  %521 = vmatpush.msra.mxu0 %v262_v36  ;;  %v307_v51 = vld [vmem:[#allocation4 + $0x198] sm:$0xff]  ;;  %v306_v55 = vld [vmem:[#allocation4 + $0x190] sm:$0xff]  ;;  %v273_v58 = vld [vmem:[#allocation4 + $0x88] sm:$0xff] }
  0x58   : > { %589 = vmatpush.msra.mxu3 %v311_v35  ;;  %567 = vmatpush.msra.mxu2 %v294_v37  ;;  %v305_v59 = vld [vmem:[#allocation4 + $0x188] sm:$0xff]  ;;  %v256_v60 = vld [vmem:[#allocation4] sm:$0xff]  ;;  %v335_v62 = vld [vmem:[#allocation4 + $0x278] sm:$0xff] }
  0x59   : > { %544 = vmatpush.msra.mxu1 %v278_v38  ;;  %522 = vmatpush.msra.mxu0 %v261_v40  ;;  %v288_v61 = vld [vmem:[#allocation4 + $0x100] sm:$0xff]  ;;  %v367_v63 = vld [vmem:[#allocation4 + $0x378] sm:$0xff]  ;;  %v334_v2 = vld [vmem:[#allocation4 + $0x270] sm:$0xff] }
  0x5a   : > { %590 = vmatpush.msra.mxu3 %v310_v39  ;;  %568 = vmatpush.msra.mxu2 %v293_v41  ;;  %v272_v0 = vld [vmem:[#allocation4 + $0x80] sm:$0xff]  ;;  %v351_v3 = vld [vmem:[#allocation4 + $0x2f8] sm:$0xff]  ;;  %v366_v4 = vld [vmem:[#allocation4 + $0x370] sm:$0xff] }
  0x5b   : > { %545 = vmatpush.msra.mxu1 %v277_v42  ;;  %523 = vmatpush.msra.mxu0 %v260_v44  ;;  %v304_v1 = vld [vmem:[#allocation4 + $0x180] sm:$0xff]  ;;  %v383_v5 = vld [vmem:[#allocation4 + $0x3f8] sm:$0xff]  ;;  %v333_v6 = vld [vmem:[#allocation4 + $0x268] sm:$0xff] }
  0x5c   : > { %591 = vmatpush.msra.mxu3 %v309_v43  ;;  %569 = vmatpush.msra.mxu2 %v292_v45  ;;  %v350_v7 = vld [vmem:[#allocation4 + $0x2f0] sm:$0xff]  ;;  %v365_v8 = vld [vmem:[#allocation4 + $0x368] sm:$0xff]  ;;  %v332_v10 = vld [vmem:[#allocation4 + $0x260] sm:$0xff] }
  0x5d   : > { %546 = vmatpush.msra.mxu1 %v276_v46  ;;  %524 = vmatpush.msra.mxu0 %v259_v48  ;;  %v382_v9 = vld [vmem:[#allocation4 + $0x3f0] sm:$0xff]  ;;  %v349_v11 = vld [vmem:[#allocation4 + $0x2e8] sm:$0xff]  ;;  %v364_v12 = vld [vmem:[#allocation4 + $0x360] sm:$0xff] }
  0x5e   : > { %592 = vmatpush.msra.mxu3 %v308_v47  ;;  %570 = vmatpush.msra.mxu2 %v291_v49  ;;  %v381_v13 = vld [vmem:[#allocation4 + $0x3e8] sm:$0xff]  ;;  %v331_v14 = vld [vmem:[#allocation4 + $0x258] sm:$0xff]  ;;  %v348_v15 = vld [vmem:[#allocation4 + $0x2e0] sm:$0xff] }
  0x5f   : > { %547 = vmatpush.msra.mxu1 %v275_v50  ;;  %525 = vmatpush.msra.mxu0 %v258_v52  ;;  %v363_v16 = vld [vmem:[#allocation4 + $0x358] sm:$0xff]  ;;  %v380_v17 = vld [vmem:[#allocation4 + $0x3e0] sm:$0xff]  ;;  %v330_v18 = vld [vmem:[#allocation4 + $0x250] sm:$0xff] }
  0x60   : > { %593 = vmatpush.msra.mxu3 %v307_v51  ;;  %571 = vmatpush.msra.mxu2 %v290_v53  ;;  %v347_v19 = vld [vmem:[#allocation4 + $0x2d8] sm:$0xff]  ;;  %v362_v20 = vld [vmem:[#allocation4 + $0x350] sm:$0xff]  ;;  %v329_v22 = vld [vmem:[#allocation4 + $0x248] sm:$0xff] }
  0x61   : > { %548 = vmatpush.msra.mxu1 %v274_v54  ;;  %526 = vmatpush.msra.mxu0 %v257_v56  ;;  %v379_v21 = vld [vmem:[#allocation4 + $0x3d8] sm:$0xff]  ;;  %v346_v23 = vld [vmem:[#allocation4 + $0x2d0] sm:$0xff]  ;;  %v361_v24 = vld [vmem:[#allocation4 + $0x348] sm:$0xff] }
  0x62   : > { %594 = vmatpush.msra.mxu3 %v306_v55  ;;  %572 = vmatpush.msra.mxu2 %v289_v57  ;;  %v378_v25 = vld [vmem:[#allocation4 + $0x3d0] sm:$0xff]  ;;  %v328_v26 = vld [vmem:[#allocation4 + $0x240] sm:$0xff]  ;;  %v345_v27 = vld [vmem:[#allocation4 + $0x2c8] sm:$0xff] }
  0x63   : > { %549 = vmatpush.msra.mxu1 %v273_v58  ;;  %527 = vmatpush.msra.mxu0 %v256_v60  ;;  %v360_v28 = vld [vmem:[#allocation4 + $0x340] sm:$0xff]  ;;  %v377_v29 = vld [vmem:[#allocation4 + $0x3c8] sm:$0xff]  ;;  %v327_v30 = vld [vmem:[#allocation4 + $0x238] sm:$0xff] }
  0x64   : > { %595 = vmatpush.msra.mxu3 %v305_v59  ;;  %573 = vmatpush.msra.mxu2 %v288_v61  ;;  %v344_v31 = vld [vmem:[#allocation4 + $0x2c0] sm:$0xff]  ;;  %v359_v32 = vld [vmem:[#allocation4 + $0x338] sm:$0xff]  ;;  %v326_v34 = vld [vmem:[#allocation4 + $0x230] sm:$0xff] }
  0x65   : > { %604 = vmatpush.msrb.mxu0 %v335_v62  ;;  %550 = vmatpush.msra.mxu1 %v272_v0  ;;  %v376_v33 = vld [vmem:[#allocation4 + $0x3c0] sm:$0xff]  ;;  %v343_v35 = vld [vmem:[#allocation4 + $0x2b8] sm:$0xff]  ;;  %v358_v36 = vld [vmem:[#allocation4 + $0x330] sm:$0xff] }
  0x66   : > { %650 = vmatpush.msrb.mxu2 %v367_v63  ;;  %596 = vmatpush.msra.mxu3 %v304_v1  ;;  %v375_v37 = vld [vmem:[#allocation4 + $0x3b8] sm:$0xff]  ;;  %v325_v38 = vld [vmem:[#allocation4 + $0x228] sm:$0xff]  ;;  %v342_v39 = vld [vmem:[#allocation4 + $0x2b0] sm:$0xff] }
  0x67   : > { %605 = vmatpush.msrb.mxu0 %v334_v2  ;;  %627 = vmatpush.msrb.mxu1 %v351_v3  ;;  %v357_v40 = vld [vmem:[#allocation4 + $0x328] sm:$0xff]  ;;  %v374_v41 = vld [vmem:[#allocation4 + $0x3b0] sm:$0xff]  ;;  %v324_v43 = vld [vmem:[#allocation4 + $0x220] sm:$0xff] }
  0x68   : > { %651 = vmatpush.msrb.mxu2 %v366_v4  ;;  %673 = vmatpush.msrb.mxu3 %v383_v5  ;;  %v226_v42 = vld [vmem:[%s1600_s7 + $0x10] sm:$0xff]  ;;  %v341_v44 = vld [vmem:[#allocation4 + $0x2a8] sm:$0xff]  ;;  %v356_v45 = vld [vmem:[#allocation4 + $0x320] sm:$0xff] }
  0x69   : > { %606 = vmatpush.msrb.mxu0 %v333_v6  ;;  %628 = vmatpush.msrb.mxu1 %v350_v7  ;;  %v373_v46 = vld [vmem:[#allocation4 + $0x3a8] sm:$0xff]  ;;  %v224_v47 = vld [vmem:[%s1600_s7] sm:$0xff]  ;;  %v227_v48 = vld [vmem:[%s1600_s7 + $0x18] sm:$0xff] }
  0x6a   : > { %652 = vmatpush.msrb.mxu2 %v365_v8  ;;  %674 = vmatpush.msrb.mxu3 %v382_v9  ;;  %v323_v49 = vld [vmem:[#allocation4 + $0x218] sm:$0xff]  ;;  %v340_v50 = vld [vmem:[#allocation4 + $0x2a0] sm:$0xff]  ;;  %v225_v53 = vld [vmem:[%s1600_s7 + $0x8] sm:$0xff] }
  0x6b   : > { %607 = vmatpush.msrb.mxu0 %v332_v10  ;;  %629 = vmatpush.msrb.mxu1 %v349_v11  ;;  %v355_v51 = vld [vmem:[#allocation4 + $0x318] sm:$0xff]  ;;  %v372_v52 = vld [vmem:[#allocation4 + $0x3a0] sm:$0xff]  ;;  %v322_v54 = vld [vmem:[#allocation4 + $0x210] sm:$0xff] }
  0x6c   : > { %653 = vmatpush.msrb.mxu2 %v364_v12  ;;  %675 = vmatpush.msrb.mxu3 %v381_v13  ;;  %v339_v55 = vld [vmem:[#allocation4 + $0x298] sm:$0xff]  ;;  %v354_v56 = vld [vmem:[#allocation4 + $0x310] sm:$0xff]  ;;  %v321_v58 = vld [vmem:[#allocation4 + $0x208] sm:$0xff] }
  0x6d   : > { %608 = vmatpush.msrb.mxu0 %v331_v14  ;;  %630 = vmatpush.msrb.mxu1 %v348_v15  ;;  %v371_v57 = vld [vmem:[#allocation4 + $0x398] sm:$0xff]  ;;  %v338_v59 = vld [vmem:[#allocation4 + $0x290] sm:$0xff]  ;;  %v353_v60 = vld [vmem:[#allocation4 + $0x308] sm:$0xff] }
  0x6e   : > { %654 = vmatpush.msrb.mxu2 %v363_v16  ;;  %676 = vmatpush.msrb.mxu3 %v380_v17  ;;  %v370_v61 = vld [vmem:[#allocation4 + $0x390] sm:$0xff]  ;;  %v320_v63 = vld [vmem:[#allocation4 + $0x200] sm:$0xff]  ;;  %v337_v0 = vld [vmem:[#allocation4 + $0x288] sm:$0xff] }
  0x6f   : > { %609 = vmatpush.msrb.mxu0 %v330_v18  ;;  %631 = vmatpush.msrb.mxu1 %v347_v19  ;;  %v242_v62 = vld [vmem:[%s1600_s7 + $0x90] sm:$0xff]  ;;  %v352_v1 = vld [vmem:[#allocation4 + $0x300] sm:$0xff]  ;;  %v369_v2 = vld [vmem:[#allocation4 + $0x388] sm:$0xff] }
  0x70   : > { %655 = vmatpush.msrb.mxu2 %v362_v20  ;;  %677 = vmatpush.msrb.mxu3 %v379_v21  ;;  %v240_v3 = vld [vmem:[%s1600_s7 + $0x80] sm:$0xff]  ;;  %v243_v4 = vld [vmem:[%s1600_s7 + $0x98] sm:$0xff]  ;;  %v241_v9 = vld [vmem:[%s1600_s7 + $0x88] sm:$0xff] }
  0x71   : > { %610 = vmatpush.msrb.mxu0 %v329_v22  ;;  %632 = vmatpush.msrb.mxu1 %v346_v23  ;;  %v399_v5 = vld [vmem:[#allocation4 + $0x478] sm:$0xff]  ;;  %v336_v7 = vld [vmem:[#allocation4 + $0x280] sm:$0xff]  ;;  %v398_v10 = vld [vmem:[#allocation4 + $0x470] sm:$0xff] }
  0x72   : > { %656 = vmatpush.msrb.mxu2 %v361_v24  ;;  %678 = vmatpush.msrb.mxu3 %v378_v25  ;;  %v431_v6 = vld [vmem:[#allocation4 + $0x578] sm:$0xff]  ;;  %v368_v8 = vld [vmem:[#allocation4 + $0x380] sm:$0xff]  ;;  %v430_v12 = vld [vmem:[#allocation4 + $0x570] sm:$0xff] }
  0x73   : > { %611 = vmatpush.msrb.mxu0 %v328_v26  ;;  %633 = vmatpush.msrb.mxu1 %v345_v27  ;;  %v415_v11 = vld [vmem:[#allocation4 + $0x4f8] sm:$0xff]  ;;  %v397_v14 = vld [vmem:[#allocation4 + $0x468] sm:$0xff]  ;;  %v414_v15 = vld [vmem:[#allocation4 + $0x4f0] sm:$0xff] }
  0x74   : > { %657 = vmatpush.msrb.mxu2 %v360_v28  ;;  %679 = vmatpush.msrb.mxu3 %v377_v29  ;;  %v447_v13 = vld [vmem:[#allocation4 + $0x5f8] sm:$0xff]  ;;  %v429_v16 = vld [vmem:[#allocation4 + $0x568] sm:$0xff]  ;;  %v446_v17 = vld [vmem:[#allocation4 + $0x5f0] sm:$0xff] }
  0x75   : > { %612 = vmatpush.msrb.mxu0 %v327_v30  ;;  %634 = vmatpush.msrb.mxu1 %v344_v31  ;;  %v230_v18 = vld [vmem:[%s1600_s7 + $0x30] sm:$0xff]  ;;  %v396_v19 = vld [vmem:[#allocation4 + $0x460] sm:$0xff]  ;;  %v413_v20 = vld [vmem:[#allocation4 + $0x4e8] sm:$0xff] }
  0x76   : > { %658 = vmatpush.msrb.mxu2 %v359_v32  ;;  %680 = vmatpush.msrb.mxu3 %v376_v33  ;;  %v428_v21 = vld [vmem:[#allocation4 + $0x560] sm:$0xff]  ;;  %v445_v22 = vld [vmem:[#allocation4 + $0x5e8] sm:$0xff]  ;;  %v231_v24 = vld [vmem:[%s1600_s7 + $0x38] sm:$0xff] }
  0x77   : > { %613 = vmatpush.msrb.mxu0 %v326_v34  ;;  %635 = vmatpush.msrb.mxu1 %v343_v35  ;;  %v228_v23 = vld [vmem:[%s1600_s7 + $0x20] sm:$0xff]  ;;  %v395_v25 = vld [vmem:[#allocation4 + $0x458] sm:$0xff]  ;;  %v229_v29 = vld [vmem:[%s1600_s7 + $0x28] sm:$0xff] }
  0x78   : > { %659 = vmatpush.msrb.mxu2 %v358_v36  ;;  %681 = vmatpush.msrb.mxu3 %v375_v37  ;;  %v412_v26 = vld [vmem:[#allocation4 + $0x4e0] sm:$0xff]  ;;  %v427_v27 = vld [vmem:[#allocation4 + $0x558] sm:$0xff]  ;;  %v394_v30 = vld [vmem:[#allocation4 + $0x450] sm:$0xff] }
  0x79   : > { %614 = vmatpush.msrb.mxu0 %v325_v38  ;;  %636 = vmatpush.msrb.mxu1 %v342_v39  ;;  %v444_v28 = vld [vmem:[#allocation4 + $0x5e0] sm:$0xff]  ;;  %v411_v31 = vld [vmem:[#allocation4 + $0x4d8] sm:$0xff]  ;;  %v426_v32 = vld [vmem:[#allocation4 + $0x550] sm:$0xff] }
  0x7a   : > { %660 = vmatpush.msrb.mxu2 %v357_v40  ;;  %682 = vmatpush.msrb.mxu3 %v374_v41  ;;  %v443_v33 = vld [vmem:[#allocation4 + $0x5d8] sm:$0xff]  ;;  %v393_v34 = vld [vmem:[#allocation4 + $0x448] sm:$0xff]  ;;  %v410_v35 = vld [vmem:[#allocation4 + $0x4d0] sm:$0xff] }
  0x7b   : > { %574 = vmatmul.f32.vlgmr.msra.gmra.mxu2 %v226_v42  ;;  %615 = vmatpush.msrb.mxu0 %v324_v43  ;;  %v425_v36 = vld [vmem:[#allocation4 + $0x548] sm:$0xff]  ;;  %v442_v37 = vld [vmem:[#allocation4 + $0x5d0] sm:$0xff]  ;;  %v392_v38 = vld [vmem:[#allocation4 + $0x440] sm:$0xff] }
  0x7c   : > { %637 = vmatpush.msrb.mxu1 %v341_v44  ;;  %661 = vmatpush.msrb.mxu2 %v356_v45  ;;  %v409_v39 = vld [vmem:[#allocation4 + $0x4c8] sm:$0xff]  ;;  %v424_v40 = vld [vmem:[#allocation4 + $0x540] sm:$0xff]  ;;  %v391_v42 = vld [vmem:[#allocation4 + $0x438] sm:$0xff] }
  0x7d   : > { %683 = vmatpush.msrb.mxu3 %v373_v46  ;;  %528 = vmatmul.f32.vlgmr.msra.gmra.mxu0 %v224_v47  ;;  %v441_v41 = vld [vmem:[#allocation4 + $0x5c8] sm:$0xff]  ;;  %v408_v43 = vld [vmem:[#allocation4 + $0x4c0] sm:$0xff]  ;;  %v423_v44 = vld [vmem:[#allocation4 + $0x538] sm:$0xff] }
  0x7e   : > { %597 = vmatmul.f32.vlgmr.msra.gmra.mxu3 %v227_v48  ;;  %616 = vmatpush.msrb.mxu0 %v323_v49  ;;  %v440_v45 = vld [vmem:[#allocation4 + $0x5c0] sm:$0xff]  ;;  %v390_v46 = vld [vmem:[#allocation4 + $0x430] sm:$0xff]  ;;  %v407_v47 = vld [vmem:[#allocation4 + $0x4b8] sm:$0xff] }
  0x7f   : > { %638 = vmatpush.msrb.mxu1 %v340_v50  ;;  %662 = vmatpush.msrb.mxu2 %v355_v51  ;;  %v422_v48 = vld [vmem:[#allocation4 + $0x530] sm:$0xff]  ;;  %v439_v49 = vld [vmem:[#allocation4 + $0x5b8] sm:$0xff]  ;;  %v389_v50 = vld [vmem:[#allocation4 + $0x428] sm:$0xff] }
  0x80   : > { %684 = vmatpush.msrb.mxu3 %v372_v52  ;;  %551 = vmatmul.f32.vlgmr.msra.gmra.mxu1 %v225_v53  ;;  %v406_v51 = vld [vmem:[#allocation4 + $0x4b0] sm:$0xff]  ;;  %v421_v52 = vld [vmem:[#allocation4 + $0x528] sm:$0xff] }
  0x81   : > { %617 = vmatpush.msrb.mxu0 %v322_v54  ;;  %639 = vmatpush.msrb.mxu1 %v339_v55  ;;  %v438_v53 = vld [vmem:[#allocation4 + $0x5b0] sm:$0xff]  ;;  %v388_v54 = vld [vmem:[#allocation4 + $0x420] sm:$0xff]  ;;  %v405_v55 = vld [vmem:[#allocation4 + $0x4a8] sm:$0xff] }
  0x82   : > { %663 = vmatpush.msrb.mxu2 %v354_v56  ;;  %685 = vmatpush.msrb.mxu3 %v371_v57  ;;  %v420_v56 = vld [vmem:[#allocation4 + $0x520] sm:$0xff]  ;;  %v437_v57 = vld [vmem:[#allocation4 + $0x5a8] sm:$0xff] }
  0x83   : > { %618 = vmatpush.msrb.mxu0 %v321_v58  ;;  %640 = vmatpush.msrb.mxu1 %v338_v59  ;;  %v244_v58 = vld [vmem:[%s1600_s7 + $0xa0] sm:$0xff]  ;;  %v246_v59 = vld [vmem:[%s1600_s7 + $0xb0] sm:$0xff] }
  0x84   : > { %664 = vmatpush.msrb.mxu2 %v353_v60  ;;  %686 = vmatpush.msrb.mxu3 %v370_v61  ;;  %v387_v60 = vld [vmem:[#allocation4 + $0x418] sm:$0xff]  ;;  %v404_v61 = vld [vmem:[#allocation4 + $0x4a0] sm:$0xff] }
  0x85   : > { %577 = vmatmul.f32.gmra.mxu2 %v242_v62  ;;  %619 = vmatpush.msrb.mxu0 %v320_v63  ;;  %v419_v62 = vld [vmem:[#allocation4 + $0x518] sm:$0xff]  ;;  %v436_v63 = vld [vmem:[#allocation4 + $0x5a0] sm:$0xff] }
  0x86   : > { %641 = vmatpush.msrb.mxu1 %v337_v0  ;;  %665 = vmatpush.msrb.mxu2 %v352_v1  ;;  %v245_v0 = vld [vmem:[%s1600_s7 + $0xa8] sm:$0xff]  ;;  %v247_v1 = vld [vmem:[%s1600_s7 + $0xb8] sm:$0xff] }
  0x87   : > { %687 = vmatpush.msrb.mxu3 %v369_v2  ;;  %531 = vmatmul.f32.gmra.mxu0 %v240_v3  ;;  %v386_v2 = vld [vmem:[#allocation4 + $0x410] sm:$0xff]  ;;  %v403_v3 = vld [vmem:[#allocation4 + $0x498] sm:$0xff] }
  0x88   : > { %600 = vmatmul.f32.gmra.mxu3 %v243_v4  ;;  %696 = vmatpush.msra.mxu0 %v399_v5  ;;  %v418_v4 = vld [vmem:[#allocation4 + $0x510] sm:$0xff]  ;;  %v435_v5 = vld [vmem:[#allocation4 + $0x598] sm:$0xff] }
  0x89   : > { %742 = vmatpush.msra.mxu2 %v431_v6  ;;  %642 = vmatpush.msrb.mxu1 %v336_v7  ;;  %v385_v6 = vld [vmem:[#allocation4 + $0x408] sm:$0xff]  ;;  %v402_v7 = vld [vmem:[#allocation4 + $0x490] sm:$0xff] }
  0x8a   : > { %688 = vmatpush.msrb.mxu3 %v368_v8  ;;  %554 = vmatmul.f32.gmra.mxu1 %v241_v9  ;;  %v417_v8 = vld [vmem:[#allocation4 + $0x508] sm:$0xff]  ;;  %v434_v9 = vld [vmem:[#allocation4 + $0x590] sm:$0xff] }
  0x8b   : > { %697 = vmatpush.msra.mxu0 %v398_v10  ;;  %719 = vmatpush.msra.mxu1 %v415_v11  ;;  %v384_v10 = vld [vmem:[#allocation4 + $0x400] sm:$0xff]  ;;  %v401_v11 = vld [vmem:[#allocation4 + $0x488] sm:$0xff] }
  0x8c   : > { %743 = vmatpush.msra.mxu2 %v430_v12  ;;  %765 = vmatpush.msra.mxu3 %v447_v13  ;;  %v416_v12 = vld [vmem:[#allocation4 + $0x500] sm:$0xff]  ;;  %v433_v13 = vld [vmem:[#allocation4 + $0x588] sm:$0xff] }
  0x8d   : > { %698 = vmatpush.msra.mxu0 %v397_v14  ;;  %720 = vmatpush.msra.mxu1 %v414_v15  ;;  %v232_v14 = vld [vmem:[%s1600_s7 + $0x40] sm:$0xff]  ;;  %v234_v15 = vld [vmem:[%s1600_s7 + $0x50] sm:$0xff] }
  0x8e   : > { %744 = vmatpush.msra.mxu2 %v429_v16  ;;  %766 = vmatpush.msra.mxu3 %v446_v17  ;;  %v463_v16 = vld [vmem:[#allocation4 + $0x678] sm:$0xff] }
  0x8f   : > { %666 = vmatmul.f32.vlgmr.msrb.gmra.mxu2 %v230_v18  ;;  %699 = vmatpush.msra.mxu0 %v396_v19  ;;  %v495_v17 = vld [vmem:[#allocation4 + $0x778] sm:$0xff]  ;;  %v400_v18 = vld [vmem:[#allocation4 + $0x480] sm:$0xff] }
  0x90   : > { %721 = vmatpush.msra.mxu1 %v413_v20  ;;  %745 = vmatpush.msra.mxu2 %v428_v21  ;;  %v432_v19 = vld [vmem:[#allocation4 + $0x580] sm:$0xff]  ;;  %v233_v20 = vld [vmem:[%s1600_s7 + $0x48] sm:$0xff]  ;;  %v235_v21 = vld [vmem:[%s1600_s7 + $0x58] sm:$0xff] }
  0x91   : > { %767 = vmatpush.msra.mxu3 %v445_v22  ;;  %620 = vmatmul.f32.vlgmr.msrb.gmra.mxu0 %v228_v23  ;;  %v462_v22 = vld [vmem:[#allocation4 + $0x670] sm:$0xff]  ;;  %v479_v23 = vld [vmem:[#allocation4 + $0x6f8] sm:$0xff] }
  0x92   : > { %689 = vmatmul.f32.vlgmr.msrb.gmra.mxu3 %v231_v24  ;;  %700 = vmatpush.msra.mxu0 %v395_v25  ;;  %v494_v24 = vld [vmem:[#allocation4 + $0x770] sm:$0xff]  ;;  %v511_v25 = vld [vmem:[#allocation4 + $0x7f8] sm:$0xff] }
  0x93   : > { %722 = vmatpush.msra.mxu1 %v412_v26  ;;  %746 = vmatpush.msra.mxu2 %v427_v27  ;;  %v461_v26 = vld [vmem:[#allocation4 + $0x668] sm:$0xff]  ;;  %v478_v27 = vld [vmem:[#allocation4 + $0x6f0] sm:$0xff] }
  0x94   : > { %768 = vmatpush.msra.mxu3 %v444_v28  ;;  %643 = vmatmul.f32.vlgmr.msrb.gmra.mxu1 %v229_v29  ;;  %v493_v28 = vld [vmem:[#allocation4 + $0x768] sm:$0xff]  ;;  %v510_v29 = vld [vmem:[#allocation4 + $0x7f0] sm:$0xff] }
  0x95   : > { %701 = vmatpush.msra.mxu0 %v394_v30  ;;  %723 = vmatpush.msra.mxu1 %v411_v31  ;;  %v460_v30 = vld [vmem:[#allocation4 + $0x660] sm:$0xff]  ;;  %v477_v31 = vld [vmem:[#allocation4 + $0x6e8] sm:$0xff] }
  0x96   : > { %747 = vmatpush.msra.mxu2 %v426_v32  ;;  %769 = vmatpush.msra.mxu3 %v443_v33  ;;  %v492_v32 = vld [vmem:[#allocation4 + $0x760] sm:$0xff]  ;;  %v509_v33 = vld [vmem:[#allocation4 + $0x7e8] sm:$0xff] }
  0x97   : > { %702 = vmatpush.msra.mxu0 %v393_v34  ;;  %724 = vmatpush.msra.mxu1 %v410_v35  ;;  %v248_v34 = vld [vmem:[%s1600_s7 + $0xc0] sm:$0xff]  ;;  %v250_v35 = vld [vmem:[%s1600_s7 + $0xd0] sm:$0xff] }
  0x98   : > { %748 = vmatpush.msra.mxu2 %v425_v36  ;;  %770 = vmatpush.msra.mxu3 %v442_v37  ;;  %v459_v36 = vld [vmem:[#allocation4 + $0x658] sm:$0xff]  ;;  %v476_v37 = vld [vmem:[#allocation4 + $0x6e0] sm:$0xff] }
  0x99   : > { %703 = vmatpush.msra.mxu0 %v392_v38  ;;  %725 = vmatpush.msra.mxu1 %v409_v39  ;;  %v491_v38 = vld [vmem:[#allocation4 + $0x758] sm:$0xff]  ;;  %v508_v39 = vld [vmem:[#allocation4 + $0x7e0] sm:$0xff] }
  0x9a   : > { %749 = vmatpush.msra.mxu2 %v424_v40  ;;  %771 = vmatpush.msra.mxu3 %v441_v41  ;;  %v249_v40 = vld [vmem:[%s1600_s7 + $0xc8] sm:$0xff]  ;;  %v251_v41 = vld [vmem:[%s1600_s7 + $0xd8] sm:$0xff] }
  0x9b   : > { %704 = vmatpush.msra.mxu0 %v391_v42  ;;  %726 = vmatpush.msra.mxu1 %v408_v43  ;;  %v458_v42 = vld [vmem:[#allocation4 + $0x650] sm:$0xff]  ;;  %v475_v43 = vld [vmem:[#allocation4 + $0x6d8] sm:$0xff] }
  0x9c   : > { %750 = vmatpush.msra.mxu2 %v423_v44  ;;  %772 = vmatpush.msra.mxu3 %v440_v45  ;;  %v490_v44 = vld [vmem:[#allocation4 + $0x750] sm:$0xff]  ;;  %v507_v45 = vld [vmem:[#allocation4 + $0x7d8] sm:$0xff] }
  0x9d   : > { %705 = vmatpush.msra.mxu0 %v390_v46  ;;  %727 = vmatpush.msra.mxu1 %v407_v47  ;;  %v457_v46 = vld [vmem:[#allocation4 + $0x648] sm:$0xff]  ;;  %v474_v47 = vld [vmem:[#allocation4 + $0x6d0] sm:$0xff] }
  0x9e   : > { %751 = vmatpush.msra.mxu2 %v422_v48  ;;  %773 = vmatpush.msra.mxu3 %v439_v49  ;;  %v489_v48 = vld [vmem:[#allocation4 + $0x748] sm:$0xff]  ;;  %v506_v49 = vld [vmem:[#allocation4 + $0x7d0] sm:$0xff] }
  0x9f   : > { %706 = vmatpush.msra.mxu0 %v389_v50  ;;  %728 = vmatpush.msra.mxu1 %v406_v51  ;;  %v456_v50 = vld [vmem:[#allocation4 + $0x640] sm:$0xff]  ;;  %v473_v51 = vld [vmem:[#allocation4 + $0x6c8] sm:$0xff] }
  0xa0   : > { %752 = vmatpush.msra.mxu2 %v421_v52  ;;  %774 = vmatpush.msra.mxu3 %v438_v53  ;;  %v488_v52 = vld [vmem:[#allocation4 + $0x740] sm:$0xff]  ;;  %v505_v53 = vld [vmem:[#allocation4 + $0x7c8] sm:$0xff] }
  0xa1   : > { %707 = vmatpush.msra.mxu0 %v388_v54  ;;  %729 = vmatpush.msra.mxu1 %v405_v55  ;;  %v455_v54 = vld [vmem:[#allocation4 + $0x638] sm:$0xff]  ;;  %v472_v55 = vld [vmem:[#allocation4 + $0x6c0] sm:$0xff] }
  0xa2   : > { %753 = vmatpush.msra.mxu2 %v420_v56  ;;  %775 = vmatpush.msra.mxu3 %v437_v57  ;;  %v487_v56 = vld [vmem:[#allocation4 + $0x738] sm:$0xff]  ;;  %v504_v57 = vld [vmem:[#allocation4 + $0x7c0] sm:$0xff] }
  0xa3   : > { %623 = vmatmul.f32.gmra.mxu0 %v244_v58  ;;  %669 = vmatmul.f32.gmra.mxu2 %v246_v59  ;;  %v454_v58 = vld [vmem:[#allocation4 + $0x630] sm:$0xff]  ;;  %v471_v59 = vld [vmem:[#allocation4 + $0x6b8] sm:$0xff] }
  0xa4   : > { %708 = vmatpush.msra.mxu0 %v387_v60  ;;  %730 = vmatpush.msra.mxu1 %v404_v61  ;;  %v486_v60 = vld [vmem:[#allocation4 + $0x730] sm:$0xff]  ;;  %v503_v61 = vld [vmem:[#allocation4 + $0x7b8] sm:$0xff] }
  0xa5   : > { %754 = vmatpush.msra.mxu2 %v419_v62  ;;  %776 = vmatpush.msra.mxu3 %v436_v63  ;;  %v453_v62 = vld [vmem:[#allocation4 + $0x628] sm:$0xff]  ;;  %v470_v63 = vld [vmem:[#allocation4 + $0x6b0] sm:$0xff] }
  0xa6   : > { %646 = vmatmul.f32.gmra.mxu1 %v245_v0  ;;  %692 = vmatmul.f32.gmra.mxu3 %v247_v1  ;;  %v485_v0 = vld [vmem:[#allocation4 + $0x728] sm:$0xff]  ;;  %v502_v1 = vld [vmem:[#allocation4 + $0x7b0] sm:$0xff] }
  0xa7   : > { %709 = vmatpush.msra.mxu0 %v386_v2  ;;  %731 = vmatpush.msra.mxu1 %v403_v3  ;;  %v452_v2 = vld [vmem:[#allocation4 + $0x620] sm:$0xff]  ;;  %v469_v3 = vld [vmem:[#allocation4 + $0x6a8] sm:$0xff] }
  0xa8   : > { %755 = vmatpush.msra.mxu2 %v418_v4  ;;  %777 = vmatpush.msra.mxu3 %v435_v5  ;;  %v484_v4 = vld [vmem:[#allocation4 + $0x720] sm:$0xff]  ;;  %v501_v5 = vld [vmem:[#allocation4 + $0x7a8] sm:$0xff] }
  0xa9   : > { %710 = vmatpush.msra.mxu0 %v385_v6  ;;  %732 = vmatpush.msra.mxu1 %v402_v7  ;;  %v451_v6 = vld [vmem:[#allocation4 + $0x618] sm:$0xff]  ;;  %v468_v7 = vld [vmem:[#allocation4 + $0x6a0] sm:$0xff] }
  0xaa   : > { %756 = vmatpush.msra.mxu2 %v417_v8  ;;  %778 = vmatpush.msra.mxu3 %v434_v9  ;;  %v483_v8 = vld [vmem:[#allocation4 + $0x718] sm:$0xff]  ;;  %v500_v9 = vld [vmem:[#allocation4 + $0x7a0] sm:$0xff] }
  0xab   : > { %711 = vmatpush.msra.mxu0 %v384_v10  ;;  %733 = vmatpush.msra.mxu1 %v401_v11  ;;  %v450_v10 = vld [vmem:[#allocation4 + $0x610] sm:$0xff]  ;;  %v467_v11 = vld [vmem:[#allocation4 + $0x698] sm:$0xff] }
  0xac   : > { %757 = vmatpush.msra.mxu2 %v416_v12  ;;  %779 = vmatpush.msra.mxu3 %v433_v13  ;;  %v482_v12 = vld [vmem:[#allocation4 + $0x710] sm:$0xff]  ;;  %v499_v13 = vld [vmem:[#allocation4 + $0x798] sm:$0xff] }
  0xad   : > { %712 = vmatmul.f32.vlgmr.msra.gmra.mxu0 %v232_v14  ;;  %758 = vmatmul.f32.vlgmr.msra.gmra.mxu2 %v234_v15  ;;  %v449_v14 = vld [vmem:[#allocation4 + $0x608] sm:$0xff]  ;;  %v466_v15 = vld [vmem:[#allocation4 + $0x690] sm:$0xff] }
  0xae   : > { %788 = vmatpush.msrb.mxu0 %v463_v16  ;;  %834 = vmatpush.msrb.mxu2 %v495_v17  ;;  %v481_v16 = vld [vmem:[#allocation4 + $0x708] sm:$0xff]  ;;  %v498_v17 = vld [vmem:[#allocation4 + $0x790] sm:$0xff] }
  0xaf   : > { %734 = vmatpush.msra.mxu1 %v400_v18  ;;  %780 = vmatpush.msra.mxu3 %v432_v19  ;;  %v448_v18 = vld [vmem:[#allocation4 + $0x600] sm:$0xff]  ;;  %v465_v19 = vld [vmem:[#allocation4 + $0x688] sm:$0xff] }
  0xb0   : > { %735 = vmatmul.f32.vlgmr.msra.gmra.mxu1 %v233_v20  ;;  %781 = vmatmul.f32.vlgmr.msra.gmra.mxu3 %v235_v21  ;;  %v480_v20 = vld [vmem:[#allocation4 + $0x700] sm:$0xff]  ;;  %v497_v21 = vld [vmem:[#allocation4 + $0x788] sm:$0xff] }
  0xb1   : > { %789 = vmatpush.msrb.mxu0 %v462_v22  ;;  %811 = vmatpush.msrb.mxu1 %v479_v23  ;;  %v236_v22 = vld [vmem:[%s1600_s7 + $0x60] sm:$0xff]  ;;  %v238_v23 = vld [vmem:[%s1600_s7 + $0x70] sm:$0xff] }
  0xb2   : > { %835 = vmatpush.msrb.mxu2 %v494_v24  ;;  %857 = vmatpush.msrb.mxu3 %v511_v25  ;;  %v464_v24 = vld [vmem:[#allocation4 + $0x680] sm:$0xff] }
  0xb3   : > { %790 = vmatpush.msrb.mxu0 %v461_v26  ;;  %812 = vmatpush.msrb.mxu1 %v478_v27  ;;  %v496_v25 = vld [vmem:[#allocation4 + $0x780] sm:$0xff]  ;;  %v237_v26 = vld [vmem:[%s1600_s7 + $0x68] sm:$0xff]  ;;  %v239_v27 = vld [vmem:[%s1600_s7 + $0x78] sm:$0xff] }
  0xb4   : > { %836 = vmatpush.msrb.mxu2 %v493_v28  ;;  %858 = vmatpush.msrb.mxu3 %v510_v29  ;;  %v252_v28 = vld [vmem:[%s1600_s7 + $0xe0] sm:$0xff]  ;;  %v254_v29 = vld [vmem:[%s1600_s7 + $0xf0] sm:$0xff] }
  0xb5   : > { %791 = vmatpush.msrb.mxu0 %v460_v30  ;;  %813 = vmatpush.msrb.mxu1 %v477_v31  ;;  %v253_v30 = vld [vmem:[%s1600_s7 + $0xe8] sm:$0xff]  ;;  %v255_v31 = vld [vmem:[%s1600_s7 + $0xf8] sm:$0xff] }
  0xb6   : > { %837 = vmatpush.msrb.mxu2 %v492_v32  ;;  %859 = vmatpush.msrb.mxu3 %v509_v33 }
  0xb7   : > { %715 = vmatmul.f32.gmra.mxu0 %v248_v34  ;;  %761 = vmatmul.f32.gmra.mxu2 %v250_v35 }
  0xb8   : > { %792 = vmatpush.msrb.mxu0 %v459_v36  ;;  %814 = vmatpush.msrb.mxu1 %v476_v37 }
  0xb9   : > { %838 = vmatpush.msrb.mxu2 %v491_v38  ;;  %860 = vmatpush.msrb.mxu3 %v508_v39 }
  0xba   : > { %738 = vmatmul.f32.gmra.mxu1 %v249_v40  ;;  %784 = vmatmul.f32.gmra.mxu3 %v251_v41 }
  0xbb   : > { %793 = vmatpush.msrb.mxu0 %v458_v42  ;;  %815 = vmatpush.msrb.mxu1 %v475_v43 }
  0xbc   : > { %839 = vmatpush.msrb.mxu2 %v490_v44  ;;  %861 = vmatpush.msrb.mxu3 %v507_v45 }
  0xbd   : > { %794 = vmatpush.msrb.mxu0 %v457_v46  ;;  %816 = vmatpush.msrb.mxu1 %v474_v47 }
  0xbe   : > { %840 = vmatpush.msrb.mxu2 %v489_v48  ;;  %862 = vmatpush.msrb.mxu3 %v506_v49 }
  0xbf   : > { %795 = vmatpush.msrb.mxu0 %v456_v50  ;;  %817 = vmatpush.msrb.mxu1 %v473_v51 }
  0xc0   : > { %841 = vmatpush.msrb.mxu2 %v488_v52  ;;  %863 = vmatpush.msrb.mxu3 %v505_v53 }
  0xc1   : > { %796 = vmatpush.msrb.mxu0 %v455_v54  ;;  %818 = vmatpush.msrb.mxu1 %v472_v55 }
  0xc2   : > { %842 = vmatpush.msrb.mxu2 %v487_v56  ;;  %864 = vmatpush.msrb.mxu3 %v504_v57 }
  0xc3   : > { %797 = vmatpush.msrb.mxu0 %v454_v58  ;;  %819 = vmatpush.msrb.mxu1 %v471_v59 }
  0xc4   : > { %843 = vmatpush.msrb.mxu2 %v486_v60  ;;  %865 = vmatpush.msrb.mxu3 %v503_v61 }
  0xc5   : > { %798 = vmatpush.msrb.mxu0 %v453_v62  ;;  %820 = vmatpush.msrb.mxu1 %v470_v63 }
  0xc6   : > { %844 = vmatpush.msrb.mxu2 %v485_v0  ;;  %866 = vmatpush.msrb.mxu3 %v502_v1 }
  0xc7   : > { %799 = vmatpush.msrb.mxu0 %v452_v2  ;;  %821 = vmatpush.msrb.mxu1 %v469_v3 }
  0xc8   : > { %845 = vmatpush.msrb.mxu2 %v484_v4  ;;  %867 = vmatpush.msrb.mxu3 %v501_v5 }
  0xc9   : > { %800 = vmatpush.msrb.mxu0 %v451_v6  ;;  %822 = vmatpush.msrb.mxu1 %v468_v7 }
  0xca   : > { %846 = vmatpush.msrb.mxu2 %v483_v8  ;;  %868 = vmatpush.msrb.mxu3 %v500_v9 }
  0xcb   : > { %801 = vmatpush.msrb.mxu0 %v450_v10  ;;  %823 = vmatpush.msrb.mxu1 %v467_v11 }
  0xcc   : > { %847 = vmatpush.msrb.mxu2 %v482_v12  ;;  %869 = vmatpush.msrb.mxu3 %v499_v13 }
  0xcd   : > { %802 = vmatpush.msrb.mxu0 %v449_v14  ;;  %824 = vmatpush.msrb.mxu1 %v466_v15 }
  0xce   : > { %848 = vmatpush.msrb.mxu2 %v481_v16  ;;  %870 = vmatpush.msrb.mxu3 %v498_v17 }
  0xcf   : > { %803 = vmatpush.msrb.mxu0 %v448_v18  ;;  %825 = vmatpush.msrb.mxu1 %v465_v19 }
  0xd0   : > { %849 = vmatpush.msrb.mxu2 %v480_v20  ;;  %871 = vmatpush.msrb.mxu3 %v497_v21  ;;  %v1282_v20 = vld [vmem:[%s1696_s2] ss:$0 sm:$0xff] }
  0xd1   : > { %804 = vmatmul.f32.vlgmr.msrb.gmra.mxu0 %v236_v22  ;;  %850 = vmatmul.f32.vlgmr.msrb.gmra.mxu2 %v238_v23 }
  0xd2   : > { %826 = vmatpush.msrb.mxu1 %v464_v24  ;;  %872 = vmatpush.msrb.mxu3 %v496_v25 }
  0xd3   : > { %827 = vmatmul.f32.vlgmr.msrb.gmra.mxu1 %v237_v26  ;;  %873 = vmatmul.f32.vlgmr.msrb.gmra.mxu3 %v239_v27 }
  0xd9   : > { %807 = vmatmul.f32.gmra.mxu0 %v252_v28  ;;  %853 = vmatmul.f32.gmra.mxu2 %v254_v29 }
  0xdb   : > { %830 = vmatmul.f32.gmra.mxu1 %v253_v30  ;;  %876 = vmatmul.f32.gmra.mxu3 %v255_v31 }
  0xfa   : > { %v529_v32 = vpop.f32.mrf.mxu0 }
  0xfd   : > { %v552_v33 = vpop.f32.mrf.mxu1 }
  0xfe   : > { %v575_v34 = vpop.f32.mrf.mxu2  ;;  %v553_v40 = vadd.f32 %v552_v33, %v529_v32 }
 0x100   : > { %v576_v43 = vadd.f32 %v575_v34, %v553_v40 }
 0x101   : > { %v598_v35 = vpop.f32.mrf.mxu3 }
 0x102   : > { %v599_v46 = vadd.f32 %v598_v35, %v576_v43 }
 0x104   : > { %v532_v36 = vpop.f32.mrf.mxu0 }
 0x107   : > { %v555_v37 = vpop.f32.mrf.mxu1 }
 0x108   : > { %v578_v38 = vpop.f32.mrf.mxu2  ;;  %v556_v44 = vadd.f32 %v555_v37, %v532_v36 }
 0x10a   : > { %v579_v49 = vadd.f32 %v578_v38, %v556_v44 }
 0x10b   : > { %v601_v39 = vpop.f32.mrf.mxu3 }
 0x10c   : > { %v602_v52 = vadd.f32 %v601_v39, %v579_v49 }
 0x10e   : > { %v621_v41 = vpop.f32.mrf.mxu0 }
 0x10f   : > { %v622_v51 = vadd.f32 %v621_v41, %v599_v46 }
 0x111   : > { %v644_v42 = vpop.f32.mrf.mxu1 }
 0x112   : > { %v667_v45 = vpop.f32.mrf.mxu2  ;;  %v645_v54 = vadd.f32 %v644_v42, %v622_v51 }
 0x114   : > { %v668_v58 = vadd.f32 %v667_v45, %v645_v54 }
 0x115   : > { %v690_v47 = vpop.f32.mrf.mxu3 }
 0x116   : > { %v691_v61 = vadd.f32 %v690_v47, %v668_v58 }
 0x120   : > { %v624_v48 = vpop.f32.mrf.mxu0 }
 0x121   : > { %v625_v56 = vadd.f32 %v624_v48, %v602_v52 }
 0x123   : > { %v647_v50 = vpop.f32.mrf.mxu1 }
 0x124   : > { %v648_v60 = vadd.f32 %v647_v50, %v625_v56 }
 0x126   : > { %v670_v53 = vpop.f32.mrf.mxu2 }
 0x127   : > { %v671_v63 = vadd.f32 %v670_v53, %v648_v60 }
 0x129   : > { %v693_v55 = vpop.f32.mrf.mxu3 }
 0x12a   : > { %v713_v57 = vpop.f32.mrf.mxu0  ;;  %v694_v3 = vadd.f32 %v693_v55, %v671_v63 }
 0x12b   : > { %v714_v0 = vadd.f32 %v713_v57, %v691_v61 }
 0x12d   : > { %v736_v59 = vpop.f32.mrf.mxu1 }
 0x12e   : > { %v737_v4 = vadd.f32 %v736_v59, %v714_v0 }
 0x130   : > { %v759_v62 = vpop.f32.mrf.mxu2 }
 0x131   : > { %v760_v6 = vadd.f32 %v759_v62, %v737_v4 }
 0x133   : > { %v782_v1 = vpop.f32.mrf.mxu3 }
 0x134   : > { %v716_v2 = vpop.f32.mrf.mxu0  ;;  %v783_v9 = vadd.f32 %v782_v1, %v760_v6 }
 0x135   : > { %v717_v7 = vadd.f32 %v716_v2, %v694_v3 }
 0x137   : > { %v739_v5 = vpop.f32.mrf.mxu1 }
 0x138   : > { %v740_v12 = vadd.f32 %v739_v5, %v717_v7 }
 0x13a   : > { %v762_v8 = vpop.f32.mrf.mxu2 }
 0x13b   : > { %v763_v15 = vadd.f32 %v762_v8, %v740_v12 }
 0x13d   : > { %v785_v10 = vpop.f32.mrf.mxu3 }
 0x13e   : > { %v786_v18 = vadd.f32 %v785_v10, %v763_v15 }
 0x14e   : > { %v805_v11 = vpop.f32.mrf.mxu0 }
 0x14f   : > { %v806_v13 = vadd.f32 %v805_v11, %v783_v9 }
 0x150   : > { %v828_v14 = vpop.f32.mrf.mxu1 }
 0x151   : > { %v829_v16 = vadd.f32 %v828_v14, %v806_v13 }
 0x154   : > { %v851_v17 = vpop.f32.mrf.mxu2 }
 0x155   : > { %v852_v19 = vadd.f32 %v851_v17, %v829_v16 }
 0x156   : > { %v808_v21 = vpop.f32.mrf.mxu0  ;;  %v874_v22 = vpop.f32.mrf.mxu3 }
 0x157   : > { %v809_v23 = vadd.f32 %v808_v21, %v786_v18  ;;  %v875_v24 = vadd.f32 %v874_v22, %v852_v19 }
 0x158   : > { %v831_v25 = vpop.f32.mrf.mxu1 }
 0x159   : > { %v884_v26 = vadd.f32 %v1282_v20, %v875_v24  ;;  %v832_v27 = vadd.f32 %v831_v25, %v809_v23 }
 0x15b   : > { %887 = vst.msk [vmem:[%s1646_s12] sm:$0xff] %vm886_vm0, %v884_v26 }
 0x15c   : > { %v854_v28 = vpop.f32.mrf.mxu2 }
 0x15d   : > { %v855_v29 = vadd.f32 %v854_v28, %v832_v27 }
 0x15e   : > { %v877_v30 = vpop.f32.mrf.mxu3 }
 0x15f   : > { %v878_v31 = vadd.f32 %v877_v30, %v855_v29  ;;  %895 = sbr.rel (!%p1530_p10) target bundleno = 395 (0x18b), region = 44 }
 0x161   : > { %v885_v32 = vadd.f32 %v1282_v20, %v878_v31 }
 0x163   : > { %888 = vst.msk [vmem:[%s1646_s12 + $0x8] sm:$0xff] %vm886_vm0, %v885_v32 }
 0x164   : > { %s1713_s29 = smov (!%p898_p8, %s897_s29), 2 }
 0x165   : > { %s1149_s11 = sshll.u32 %s1713_s29, 3 }
 0x166   : > { %p1152_p2 = scmp.eq.s32.totalorder %s1149_s11, 0 }
 0x167   : > { %s1663_s23 = sshrl.u32 (!%p1152_p2), %s1713_s29, 1 }
 0x168   : > { %906 = sbr.rel (%p1152_p2) target bundleno = 395 (0x18b), region = 48  ;;  %p1153_p10 = scmp.le.s32.totalorder (!%p1152_p2), %s1663_s23, 0 }
 0x16d   : > { %1074 = sbr.rel (%p1153_p10) target bundleno = 378 (0x17a), region = 130  ;;  %s1424_s16 = smov (!%p1153_p10), %s1657_s10  }
 0x16e   : > { %s1428_s18 = smov (!%p1153_p10), %s1646_s12   ;;  %s1432_s21 = smov (!%p1153_p10), 0  }
 0x16f   : > { %s1436_s25 = smov (!%p1153_p10), 0  }
 0x172 LB: >> { %v971_v33 = vld [vmem:[%s1430_s18] sm:$0xff]  ;;  %v973_v34 = vld [vmem:[%s1430_s18 + $0x8] sm:$0xff]  ;;  %s975_s26 = sadd.s32 1, %s1434_s21  ;;  %s965_s25 = sadd.s32 1, %s1438_s25   ;;  %s1438_s25 = sphi %s1436_s25, %s965_s25   ;;  %s1434_s21 = sphi %s1432_s21, %s1433_s21   ;;  %s1430_s18 = sphi %s1428_s18, %s980_s18   ;;  %s1426_s16 = sphi %s1424_s16, %s981_s16  }
 0x173   : >> { %972 = vst [vmem:[%s1426_s16] sm:$0xff] %v971_v33  ;;  %p976_p6 = scmp.ge.s32.totalorder %s975_s26, %s1663_s23  ;;  %p964_p7 = scmp.ge.s32.totalorder %s965_s25, %s1663_s23 }
 0x174   : >> { %974 = vst [vmem:[%s1426_s16 + $0x8] sm:$0xff] %v973_v34 }
 0x175   : >> { %s1715_s26 = smov (%p976_p6, %s975_s26), 0  ;;  %967 = sbr.rel (!%p964_p7) target bundleno = 370 (0x172), region = 136 }
 0x176   : >> { %s1154_s27 = sshll.u32 %s1715_s26, 4  ;;  %s1433_s21 = smov %s1715_s26  }
 0x177   : >> { %s980_s18 = scalar_lea.vmem %s1646_s12, %s1154_s27 [#allocation6]   ;;  %s981_s16 = scalar_lea.vmem %s1657_s10, %s1154_s27  }
 0x17a PF: > { %s1673_s4 = sand.u32 1, %s1713_s29   ;;  %s1168_s5 = sshll.u32 %s1663_s23, 4 }
 0x17b   : > { %s986_s6 = scalar_lea.vmem %s1646_s12, %s1168_s5 [#allocation6]   ;;  %s988_s15 = scalar_lea.vmem %s1657_s10, %s1168_s5  }
 0x17c   : > { %p1159_p9 = scmp.le.s32.totalorder %s1673_s4, 0 }
 0x17d   : > { %s1440_s7 = smov (!%p1159_p9), %s988_s15   ;;  %s1444_s22 = smov (!%p1159_p9), %s986_s6  }
 0x17e   : > { %1088 = sbr.rel (%p1159_p9) target bundleno = 395 (0x18b), region = 141  ;;  %s1448_s24 = smov (!%p1159_p9), 0  }
 0x17f   : > { %s1452_s8 = smov (!%p1159_p9), 0  }
 0x183 LB: >> { %v998_v35 = vld [vmem:[%s1446_s22] sm:$0xff]  ;;  %s1000_s19 = sadd.s32 1, %s1450_s24  ;;  %s992_s8 = sadd.s32 1, %s1454_s8   ;;  %s1454_s8 = sphi %s1452_s8, %s992_s8   ;;  %s1450_s24 = sphi %s1448_s24, %s1449_s24   ;;  %s1446_s22 = sphi %s1444_s22, %s1005_s22   ;;  %s1442_s7 = sphi %s1440_s7, %s1006_s7  }
 0x184   : >> { %999 = vst [vmem:[%s1442_s7] sm:$0xff] %v998_v35  ;;  %p1001_p12 = scmp.ge.s32.totalorder %s1000_s19, %s1673_s4  ;;  %p991_p13 = scmp.ge.s32.totalorder %s992_s8, %s1673_s4 }
 0x186   : >> { %s1717_s19 = smov (%p1001_p12, %s1000_s19), 0  ;;  %994 = sbr.rel (!%p991_p13) target bundleno = 387 (0x183), region = 147 }
 0x187   : >> { %s1160_s12 = sshll.u32 %s1717_s19, 3  ;;  %s1449_s24 = smov %s1717_s19  }
 0x188   : >> { %s1005_s22 = scalar_lea.vmem %s986_s6, %s1160_s12 [#allocation6]   ;;  %s1006_s7 = scalar_lea.vmem %s988_s15, %s1160_s12  }
 0x18b PF: > { %p14_p0 = scmp.ge.s32.totalorder %s1504_s17, 5   ;;  %s1706_s12 = smov %s1414_s13 }
 0x18c   : > { %s1707_s13 = smov %s1418_s14  ;;  %s1708_s14 = smov %s1514_s20 }
 0x18d   : > { %s1709_s15 = smov %s1504_s17  ;;  %16 = sbr.rel (!%p14_p0) target bundleno = 4 (0x4), region = 158 }
 0x192   :  { %1022 = vsyncpa [#allocation3], 1 }
 0x193   :  { %1024 = vsyncpa [#allocation3 + $0x1], 1 }
 0x194   :  { %1025 = vsyncpa [#allocation5], 1 }

</bundles_post_ra>
